<compile_context>
chip_gen: v5e
topology: v5e:2x2
jax: 0.10.0
libtpu: 0.0.40
codegen_flags: <defaults>
</compile_context>

<pallas_src>
import functools

import jax
import jax.numpy as jnp
from jax import lax
from jax.experimental import pallas as pl
from jax.experimental.pallas import tpu as pltpu

BN_EPS = 1e-5


# ---------------------------------------------------------------------------
# Pass 1: conv (matmul) + per-channel sum / sum-of-squares accumulation.
# ---------------------------------------------------------------------------
def _conv_stats_kernel(patches_ref, w_ref, gamma_ref, beta_ref, y_ref, affine_ref, *,
                       m_total):
    # patches_ref: (TM, K)       compute_dtype
    # w_ref:       (K, C_out)    compute_dtype
    # gamma_ref:   (1, C_out)    f32
    # beta_ref:    (1, C_out)    f32
    # y_ref:       (TM, C_out)   f32   (conv output tile)
    # affine_ref:  (2, C_out)    f32   (accumulator; becomes [scale; bias] at the end)
    y = jnp.dot(patches_ref[...], w_ref[...], preferred_element_type=jnp.float32)
    y_ref[...] = y

    s = jnp.sum(y, axis=0, keepdims=True)        # (1, C_out)  per-channel sum
    ss = jnp.sum(y * y, axis=0, keepdims=True)   # (1, C_out)  per-channel sum of squares
    partial = jnp.concatenate([s, ss], axis=0)   # (2, C_out)

    i = pl.program_id(0)

    @pl.when(i == 0)
    def _init():
        affine_ref[...] = partial

    @pl.when(i > 0)
    def _accumulate():
        affine_ref[...] += partial

    # Final step: fold batch statistics + gamma/beta into (scale, bias) so the apply
    # pass is a single multiply-add per element.  Zero-padded rows of the patch matrix
    # contribute 0 to both sums, so dividing by the true m_total stays exact.
    @pl.when(i == pl.num_programs(0) - 1)
    def _finalize():
        acc = affine_ref[...]
        inv_m = jnp.float32(1.0 / float(m_total))
        mean = acc[0:1, :] * inv_m
        ex2 = acc[1:2, :] * inv_m
        var = ex2 - mean * mean                       # biased variance (PyTorch normalization)
        scale = gamma_ref[...] * lax.rsqrt(var + BN_EPS)
        bias = beta_ref[...] - mean * scale
        affine_ref[...] = jnp.concatenate([scale, bias], axis=0)


# ---------------------------------------------------------------------------
# Pass 2: elementwise BN apply (one FMA per element).
# ---------------------------------------------------------------------------
def _bn_apply_kernel(y_ref, affine_ref, out_ref):
    # y_ref:      (TM, C_out) f32
    # affine_ref: (2, C_out)  f32  ([scale; bias])
    # out_ref:    (TM, C_out) f32
    aff = affine_ref[...]
    scale = aff[0:1, :]
    bias = aff[1:2, :]
    out_ref[...] = (y_ref[...] * scale + bias).astype(out_ref.dtype)


# ---------------------------------------------------------------------------
# Glue: im2col (true width K = C_in*9, no lane padding).
# ---------------------------------------------------------------------------
def _im2col_3x3_pad1(x_nchw):
    """x: (N, C, H, W) -> patches (N*H*W, C*9); column order (ci, kh, kw) to match
    PyTorch's weight.reshape(C_out, C_in*9)."""
    N, C, H, W = x_nchw.shape
    xp = jnp.pad(x_nchw, ((0, 0), (0, 0), (1, 1), (1, 1)))
    cols = []
    for kh in range(3):
        for kw in range(3):
            cols.append(xp[:, :, kh:kh + H, kw:kw + W])  # (N, C, H, W)
    patches = jnp.stack(cols, axis=2)                    # (N, C, 9, H, W)
    patches = patches.transpose(0, 3, 4, 1, 2)           # (N, H, W, C, 9)
    return patches.reshape(N * H * W, C * 9)


def cnn_bn_forward(x_nchw, conv_weight, bn_gamma, bn_beta, *,
                   weight_scale=1.0, compute_dtype=jnp.float32):
    """Forward of CNNBN: conv2d(3x3, s=1, p=1, bias=False) + BatchNorm2d (batch stats).

    x_nchw:      (N, C_in, H, W)       f32
    conv_weight: (C_out, C_in, 3, 3)   f32  (PyTorch layout)
    bn_gamma:    (C_out,)              f32
    bn_beta:     (C_out,)              f32
    weight_scale: optional scalar applied to the conv weight (e.g. 1/sigma if a
                  spectral-norm variant normalizes at forward time).
    returns:     (N, C_out, H, W)      f32
    """
    N, C_in, H, W = x_nchw.shape
    C_out = conv_weight.shape[0]
    K = C_in * 9
    M = N * H * W

    # Row-tile size: big tiles for real workloads, small for toy shapes so that the
    # multi-tile accumulation path is actually exercised.  Sized well under the 32 MiB
    # scoped-VMEM default (and v7x's 64 MiB physical) including double-buffering.
    TM = 1024 if M >= 4096 else 128
    M_pad = ((M + TM - 1) // TM) * TM
    num_tiles = M_pad // TM

    itemsize = 2 if compute_dtype == jnp.bfloat16 else 4

    # Glue: im2col at true width K; zero-pad rows to a tile multiple (zero rows
    # contribute nothing to the BN sums, so statistics stay exact).
    patches = _im2col_3x3_pad1(x_nchw.astype(jnp.float32))      # (M, K)
    if M_pad != M:
        patches = jnp.pad(patches, ((0, M_pad - M), (0, 0)))
    patches = patches.astype(compute_dtype)                     # (M_pad, K)

    w_mat = (conv_weight.reshape(C_out, K).T.astype(jnp.float32)
             * jnp.float32(weight_scale)).astype(compute_dtype)  # (K, C_out)
    gamma = bn_gamma.astype(jnp.float32).reshape(1, C_out)
    beta = bn_beta.astype(jnp.float32).reshape(1, C_out)

    # ---------------- pass 1: conv + stats ----------------
    conv_cost = pl.CostEstimate(
        flops=int(2 * M_pad * K * C_out),
        transcendentals=int(C_out),
        bytes_accessed=int((M_pad * K + K * C_out) * itemsize
                           + (M_pad * C_out + 4 * C_out) * 4),
    )
    y_flat, affine = pl.pallas_call(
        functools.partial(_conv_stats_kernel, m_total=M),
        out_shape=(
            jax.ShapeDtypeStruct((M_pad, C_out), jnp.float32),
            jax.ShapeDtypeStruct((2, C_out), jnp.float32),
        ),
        grid_spec=pltpu.PrefetchScalarGridSpec(
            num_scalar_prefetch=0,
            grid=(num_tiles,),
            in_specs=[
                pl.BlockSpec((TM, K), lambda i: (i, 0)),
                pl.BlockSpec((K, C_out), lambda i: (0, 0)),
                pl.BlockSpec((1, C_out), lambda i: (0, 0)),
                pl.BlockSpec((1, C_out), lambda i: (0, 0)),
            ],
            out_specs=(
                pl.BlockSpec((TM, C_out), lambda i: (i, 0)),
                pl.BlockSpec((2, C_out), lambda i: (0, 0)),   # resident accumulator
            ),
        ),
        compiler_params=pltpu.CompilerParams(
            dimension_semantics=("arbitrary",),               # stats accumulation is sequential
            vmem_limit_bytes=32 * 1024 * 1024,
        ),
        cost_estimate=conv_cost,
    )(patches, w_mat, gamma, beta)

    # ---------------- pass 2: elementwise BN apply ----------------
    apply_cost = pl.CostEstimate(
        flops=int(2 * M_pad * C_out),
        transcendentals=0,
        bytes_accessed=int(2 * M_pad * C_out * 4 + 2 * C_out * 4),
    )
    out_flat = pl.pallas_call(
        _bn_apply_kernel,
        out_shape=jax.ShapeDtypeStruct((M_pad, C_out), jnp.float32),
        grid_spec=pltpu.PrefetchScalarGridSpec(
            num_scalar_prefetch=0,
            grid=(num_tiles,),
            in_specs=[
                pl.BlockSpec((TM, C_out), lambda i: (i, 0)),
                pl.BlockSpec((2, C_out), lambda i: (0, 0)),
            ],
            out_specs=pl.BlockSpec((TM, C_out), lambda i: (i, 0)),
        ),
        compiler_params=pltpu.CompilerParams(
            dimension_semantics=("parallel",),                # independent tiles -> megacore
            vmem_limit_bytes=32 * 1024 * 1024,
        ),
        cost_estimate=apply_cost,
    )(y_flat, affine)

    # Glue: drop the row padding, restore NCHW.
    out = out_flat[:M].reshape(N, H, W, C_out).transpose(0, 3, 1, 2)
    return out


def _reference(x_nchw, conv_weight, bn_gamma, bn_beta):
    """Pure-JAX reference (lax.conv + batch-stat BN) for the correctness check."""
    y = lax.conv_general_dilated(
        x_nchw, conv_weight,
        window_strides=(1, 1), padding=((1, 1), (1, 1)),
        dimension_numbers=("NCHW", "OIHW", "NCHW"),
    )
    mean = jnp.mean(y, axis=(0, 2, 3), keepdims=True)
    var = jnp.mean((y - mean) ** 2, axis=(0, 2, 3), keepdims=True)
    return (y - mean) * lax.rsqrt(var + BN_EPS) * bn_gamma.reshape(1, -1, 1, 1) \
        + bn_beta.reshape(1, -1, 1, 1)


if __name__ == "__main__":
    # Small shapes consistent with the module: batch=2, in_planes=4, out_planes=8, 16x16 spatial.
    N, C_in, C_out, H, W = 2, 4, 8, 16, 16

    key = jax.random.PRNGKey(0)
    kx, kw, kg, kb = jax.random.split(key, 4)
    x = jax.random.normal(kx, (N, C_in, H, W), dtype=jnp.float32)
    fan_in = C_in * 3 * 3
    conv_w = jax.random.normal(kw, (C_out, C_in, 3, 3), dtype=jnp.float32) * (2.0 / fan_in) ** 0.5
    # BN params: start from PyTorch defaults (1, 0) with a small perturbation so the
    # affine path is actually exercised.
    gamma = 1.0 + 0.1 * jax.random.normal(kg, (C_out,), dtype=jnp.float32)
    beta = 0.1 * jax.random.normal(kb, (C_out,), dtype=jnp.float32)

    out = jax.block_until_ready(cnn_bn_forward(x, conv_w, gamma, beta))
    ref = jax.block_until_ready(_reference(x, conv_w, gamma, beta))

    assert out.shape == (N, C_out, H, W), out.shape
    assert jnp.allclose(out, ref, atol=1e-4, rtol=1e-4), float(jnp.max(jnp.abs(out - ref)))

    print("KERNEL_OK")
</pallas_src>

<mosaic_0001>
module attributes {stable_mosaic.version = 11 : i64} {
  func.func @_conv_stats_kernel(%arg0: i32, %arg1: memref<128x36xf32, #tpu.memory_space<vmem>>, %arg2: memref<36x8xf32, #tpu.memory_space<vmem>>, %arg3: memref<1x8xf32, #tpu.memory_space<vmem>>, %arg4: memref<1x8xf32, #tpu.memory_space<vmem>>, %arg5: memref<128x8xf32, #tpu.memory_space<vmem>>, %arg6: memref<2x8xf32, #tpu.memory_space<vmem>>) attributes {dimension_semantics = [#tpu.dimension_semantics<arbitrary>], iteration_bounds = array<i64: 4>, scalar_prefetch = 0 : i64, scratch_operands = 0 : i64, tpu.core_type = #tpu.core_type<tc>, window_params = [{transform_indices = @transform_0, window_bounds = array<i64: 128, 36>}, {pipeline_mode = #tpu.pipeline_mode<synchronous>, transform_indices = @transform_1, window_bounds = array<i64: 36, 8>}, {pipeline_mode = #tpu.pipeline_mode<synchronous>, transform_indices = @transform_2, window_bounds = array<i64: 1, 8>}, {pipeline_mode = #tpu.pipeline_mode<synchronous>, transform_indices = @transform_3, window_bounds = array<i64: 1, 8>}, {transform_indices = @transform_4, window_bounds = array<i64: 128, 8>}, {pipeline_mode = #tpu.pipeline_mode<synchronous>, transform_indices = @transform_5, window_bounds = array<i64: 2, 8>}]} {
    %c0 = arith.constant 0 : index
    %c0_0 = arith.constant 0 : index
    %0 = vector.load %arg1[%c0, %c0_0] : memref<128x36xf32, #tpu.memory_space<vmem>>, vector<128x36xf32>
    %c0_1 = arith.constant 0 : index
    %c0_2 = arith.constant 0 : index
    %1 = vector.load %arg2[%c0_1, %c0_2] : memref<36x8xf32, #tpu.memory_space<vmem>>, vector<36x8xf32>
    %cst = arith.constant dense<0.000000e+00> : vector<128x8xf32>
    %2 = tpu.matmul %0, %1, %cst {dimension_numbers = #tpu.dot_dimension_numbers<[1], [0], [0], [1], [0, 0, 1, 1], [], []>} : vector<128x36xf32>, vector<36x8xf32>, vector<128x8xf32> -> vector<128x8xf32>
    %c0_3 = arith.constant 0 : index
    %c0_4 = arith.constant 0 : index
    %3 = vector.load %arg5[%c0_3, %c0_4] : memref<128x8xf32, #tpu.memory_space<vmem>>, vector<128x8xf32>
    tpu.vector_store %arg5[%c0_3, %c0_4], %2 {strides = array<i32>} : memref<128x8xf32, #tpu.memory_space<vmem>>, vector<128x8xf32>,
    %cst_5 = arith.constant dense<0.000000e+00> : vector<8xf32>
    %4 = vector.multi_reduction <add>, %2, %cst_5 [0] : vector<128x8xf32> to vector<8xf32>
    %5 = vector.shape_cast %4 : vector<8xf32> to vector<1x8xf32>
    %6 = arith.mulf %2, %2 : vector<128x8xf32>
    %cst_6 = arith.constant dense<0.000000e+00> : vector<8xf32>
    %7 = vector.multi_reduction <add>, %6, %cst_6 [0] : vector<128x8xf32> to vector<8xf32>
    %8 = vector.shape_cast %7 : vector<8xf32> to vector<1x8xf32>
    %9 = tpu.concatenate %5, %8 in 0 : vector<1x8xf32>, vector<1x8xf32> -> vector<2x8xf32>
    %c0_i32 = arith.constant 0 : i32
    %10 = arith.cmpi eq, %arg0, %c0_i32 : i32
    %11 = arith.extui %10 : i1 to i32
    %c0_i32_7 = arith.constant 0 : i32
    %12 = arith.cmpi ne, %11, %c0_i32_7 : i32
    scf.if %12 {
      %c0_11 = arith.constant 0 : index
      %c0_12 = arith.constant 0 : index
      %19 = vector.load %arg6[%c0_11, %c0_12] : memref<2x8xf32, #tpu.memory_space<vmem>>, vector<2x8xf32>
      tpu.vector_store %arg6[%c0_11, %c0_12], %9 {strides = array<i32>} : memref<2x8xf32, #tpu.memory_space<vmem>>, vector<2x8xf32>,
    } else {
    }
    %c0_i32_8 = arith.constant 0 : i32
    %13 = arith.cmpi sgt, %arg0, %c0_i32_8 : i32
    %14 = arith.extui %13 : i1 to i32
    %c0_i32_9 = arith.constant 0 : i32
    %15 = arith.cmpi ne, %14, %c0_i32_9 : i32
    scf.if %15 {
      %c0_11 = arith.constant 0 : index
      %c0_12 = arith.constant 0 : index
      %19 = vector.load %arg6[%c0_11, %c0_12] : memref<2x8xf32, #tpu.memory_space<vmem>>, vector<2x8xf32>
      %20 = arith.addf %19, %9 : vector<2x8xf32>
      %c0_13 = arith.constant 0 : index
      %c0_14 = arith.constant 0 : index
      %21 = vector.load %arg6[%c0_13, %c0_14] : memref<2x8xf32, #tpu.memory_space<vmem>>, vector<2x8xf32>
      tpu.vector_store %arg6[%c0_13, %c0_14], %20 {strides = array<i32>} : memref<2x8xf32, #tpu.memory_space<vmem>>, vector<2x8xf32>,
    } else {
    }
    %c3_i32 = arith.constant 3 : i32
    %16 = arith.cmpi eq, %arg0, %c3_i32 : i32
    %17 = arith.extui %16 : i1 to i32
    %c0_i32_10 = arith.constant 0 : i32
    %18 = arith.cmpi ne, %17, %c0_i32_10 : i32
    scf.if %18 {
      %c0_11 = arith.constant 0 : index
      %c0_12 = arith.constant 0 : index
      %19 = vector.load %arg6[%c0_11, %c0_12] : memref<2x8xf32, #tpu.memory_space<vmem>>, vector<2x8xf32>
      %20 = vector.extract_strided_slice %19 {offsets = [0, 0], sizes = [1, 8], strides = [1, 1]} : vector<2x8xf32> to vector<1x8xf32>
      %cst_13 = arith.constant 0.001953125 : f32
      %21 = vector.broadcast %cst_13 : f32 to vector<1x8xf32>
      %22 = arith.mulf %20, %21 : vector<1x8xf32>
      %23 = vector.extract_strided_slice %19 {offsets = [1, 0], sizes = [1, 8], strides = [1, 1]} : vector<2x8xf32> to vector<1x8xf32>
      %cst_14 = arith.constant 0.001953125 : f32
      %24 = vector.broadcast %cst_14 : f32 to vector<1x8xf32>
      %25 = arith.mulf %23, %24 : vector<1x8xf32>
      %26 = arith.mulf %22, %22 : vector<1x8xf32>
      %27 = arith.subf %25, %26 : vector<1x8xf32>
      %c0_15 = arith.constant 0 : index
      %c0_16 = arith.constant 0 : index
      %28 = vector.load %arg3[%c0_15, %c0_16] : memref<1x8xf32, #tpu.memory_space<vmem>>, vector<1x8xf32>
      %cst_17 = arith.constant 9.99999974E-6 : f32
      %29 = vector.broadcast %cst_17 : f32 to vector<1x8xf32>
      %30 = arith.addf %27, %29 : vector<1x8xf32>
      %31 = math.rsqrt %30 : vector<1x8xf32>
      %32 = arith.mulf %28, %31 : vector<1x8xf32>
      %c0_18 = arith.constant 0 : index
      %c0_19 = arith.constant 0 : index
      %33 = vector.load %arg4[%c0_18, %c0_19] : memref<1x8xf32, #tpu.memory_space<vmem>>, vector<1x8xf32>
      %34 = arith.mulf %22, %32 : vector<1x8xf32>
      %35 = arith.subf %33, %34 : vector<1x8xf32>
      %36 = tpu.concatenate %32, %35 in 0 : vector<1x8xf32>, vector<1x8xf32> -> vector<2x8xf32>
      %c0_20 = arith.constant 0 : index
      %c0_21 = arith.constant 0 : index
      %37 = vector.load %arg6[%c0_20, %c0_21] : memref<2x8xf32, #tpu.memory_space<vmem>>, vector<2x8xf32>
      tpu.vector_store %arg6[%c0_20, %c0_21], %36 {strides = array<i32>} : memref<2x8xf32, #tpu.memory_space<vmem>>, vector<2x8xf32>,
    } else {
    }
    return
  }
  func.func @transform_0(%arg0: i32) -> (i32, i32) {
    %c0_i32 = arith.constant 0 : i32
    %c0_i32_0 = arith.constant 0 : i32
    return %arg0, %c0_i32 : i32, i32
  }
  func.func @transform_1(%arg0: i32) -> (i32, i32) {
    %c0_i32 = arith.constant 0 : i32
    %c0_i32_0 = arith.constant 0 : i32
    %c0_i32_1 = arith.constant 0 : i32
    return %c0_i32, %c0_i32_0 : i32, i32
  }
  func.func @transform_2(%arg0: i32) -> (i32, i32) {
    %c0_i32 = arith.constant 0 : i32
    %c0_i32_0 = arith.constant 0 : i32
    %c0_i32_1 = arith.constant 0 : i32
    return %c0_i32, %c0_i32_0 : i32, i32
  }
  func.func @transform_3(%arg0: i32) -> (i32, i32) {
    %c0_i32 = arith.constant 0 : i32
    %c0_i32_0 = arith.constant 0 : i32
    %c0_i32_1 = arith.constant 0 : i32
    return %c0_i32, %c0_i32_0 : i32, i32
  }
  func.func @transform_4(%arg0: i32) -> (i32, i32) {
    %c0_i32 = arith.constant 0 : i32
    %c0_i32_0 = arith.constant 0 : i32
    return %arg0, %c0_i32 : i32, i32
  }
  func.func @transform_5(%arg0: i32) -> (i32, i32) {
    %c0_i32 = arith.constant 0 : i32
    %c0_i32_0 = arith.constant 0 : i32
    %c0_i32_1 = arith.constant 0 : i32
    return %c0_i32, %c0_i32_0 : i32, i32
  }
}

</mosaic_0001>

<bundles_post_ra>
// kernel: tpu_custom_call.1
= control target key start
LH: loop header
LB: loop body
LE: loop exit
PB: predicated region body
PF: predicated region fallthrough
CT: control target
= control target key end

     0   :  { %11 = vsyncpa [#allocation3], 0  ;;  %s745_s18 = smov 0   ;;  %s914_s0 = inlined_call_operand.vmem [shape: f32[512,36], index: 0, kind: input, shape index: {}]   ;;  %s915_s1 = inlined_call_operand.vmem [shape: f32[36,8], index: 1, kind: input, shape index: {}]   ;;  %s916_s2 = inlined_call_operand.vmem [shape: f32[1,8], index: 2, kind: input, shape index: {}]   ;;  %s917_s3 = inlined_call_operand.vmem [shape: f32[1,8], index: 3, kind: input, shape index: {}]   ;;  %s918_s4 = inlined_call_operand.vmem [shape: f32[512,8], index: 4, kind: output, shape index: {0}]   ;;  %s919_s5 = inlined_call_operand.hbm [shape: f32[2,8], index: 5, kind: output, shape index: {1}]  }
   0x1 LB: > { %s751_s19 = sadd.s32 4294967295, %s712_s18   ;;  %p613_p0 = scmp.ge.s32.totalorder %s712_s18, 1  ;;  %s712_s18 = sphi %s745_s18, %s17_s18  }
   0x2   : > { %p187_p1 = scmp.lt.s32.totalorder %s712_s18, 5 }
   0x4   : > { %p188_p2 = pnand %p613_p0, %p187_p1 }
   0x5   : > { %s614_s24 = sshll.u32 (!%p188_p2), %s751_s19, 4  ;;  %p635_p4 = scmp.ne.s32.totalorder (!%p188_p2), %s751_s19, 0 }
   0x6   : > { %191 = sbr.rel (%p188_p2) target bundleno = 285 (0x11d), region = 36  ;;  %p216_p3 = scmp.lt.s32.totalorder (!%p188_p2), %s614_s24, 63 }
   0xb   : > { %v247_v0 = vld [vmem:[%s915_s1 + $0x20] sm:$0xf]  ;;  %vm297_vm0 = vcmask 1043456   ;;  %v246_v1 = vld [vmem:[%s915_s1 + $0x18] sm:$0xff]  ;;  %v245_v2 = vld [vmem:[%s915_s1 + $0x10] sm:$0xff]  ;;  %s921_s24 = smov (!%p216_p3, %s614_s24), 63 }
   0xc   : > { %618 = vmatpush.msk.msra.mxu0 %vm297_vm0, %v247_v0  ;;  %642 = vmatpush.msk.msra.mxu1 %vm297_vm0, %v247_v0  ;;  %v244_v3 = vld [vmem:[%s915_s1 + $0x8] sm:$0xff]  ;;  %s615_s29 = sshll.u32 %s921_s24, 3  ;;  %v243_v4 = vld [vmem:[%s915_s1] sm:$0xff]  ;;  %vm248_vm1 = vcmask 293888   ;;  %vm366_vm2 = vcmask 64512   ;;  %vm473_vm3 = vcmask 1040384  }
   0xd   : > { %643 = vmatpush.msk.msra.mxu2 %vm297_vm0, %v247_v0  ;;  %644 = vmatpush.msk.msra.mxu3 %vm297_vm0, %v247_v0  ;;  %s779_s9 = scalar_lea.vmem %s914_s0, %s615_s29  ;;  %s818_s12 = scalar_lea.vmem %s918_s4, %s615_s29 }
   0xe   : > { %313 = vmatpush.msra.mxu0 %v246_v1  ;;  %645 = vmatpush.msra.mxu1 %v246_v1  ;;  %v227_v5 = vld [vmem:[%s779_s9] sm:$0xff]  ;;  %v228_v9 = vld [vmem:[%s779_s9 + $0x8] sm:$0xff]  ;;  %v229_v13 = vld [vmem:[%s779_s9 + $0x10] sm:$0xff] }
   0xf   : > { %646 = vmatpush.msra.mxu2 %v246_v1  ;;  %647 = vmatpush.msra.mxu3 %v246_v1  ;;  %v231_v6 = vld [vmem:[%s779_s9 + $0x20] sm:$0xff]  ;;  %v232_v10 = vld [vmem:[%s779_s9 + $0x28] sm:$0xff]  ;;  %v233_v14 = vld [vmem:[%s779_s9 + $0x30] sm:$0xff] }
  0x10   : > { %314 = vmatpush.msra.mxu0 %v245_v2  ;;  %648 = vmatpush.msra.mxu1 %v245_v2  ;;  %v235_v7 = vld [vmem:[%s779_s9 + $0x40] sm:$0xff]  ;;  %v236_v11 = vld [vmem:[%s779_s9 + $0x48] sm:$0xff]  ;;  %v237_v15 = vld [vmem:[%s779_s9 + $0x50] sm:$0xff] }
  0x11   : > { %649 = vmatpush.msra.mxu2 %v245_v2  ;;  %650 = vmatpush.msra.mxu3 %v245_v2  ;;  %v239_v8 = vld [vmem:[%s779_s9 + $0x60] sm:$0xff]  ;;  %v240_v12 = vld [vmem:[%s779_s9 + $0x68] sm:$0xff]  ;;  %v241_v16 = vld [vmem:[%s779_s9 + $0x70] sm:$0xff] }
  0x12   : > { %315 = vmatpush.msra.mxu0 %v244_v3  ;;  %651 = vmatpush.msra.mxu1 %v244_v3  ;;  %v230_v17 = vld [vmem:[%s779_s9 + $0x18] sm:$0xff] }
  0x13   : > { %652 = vmatpush.msra.mxu2 %v244_v3  ;;  %653 = vmatpush.msra.mxu3 %v244_v3  ;;  %v234_v18 = vld [vmem:[%s779_s9 + $0x38] sm:$0xff] }
  0x14   : > { %316 = vmatpush.msra.mxu0 %v243_v4  ;;  %654 = vmatpush.msra.mxu1 %v243_v4  ;;  %v238_v19 = vld [vmem:[%s779_s9 + $0x58] sm:$0xff] }
  0x15   : > { %619 = vmatmul.msk.f32.vlgmr.msra.gmra.mxu0 %vm248_vm1, %v227_v5  ;;  %623 = vmatmul.msk.f32.vlgmr.msra.gmra.mxu1 %vm248_vm1, %v231_v6  ;;  %v242_v20 = vld [vmem:[%s779_s9 + $0x78] sm:$0xff] }
  0x16   : > { %655 = vmatpush.msra.mxu2 %v243_v4  ;;  %656 = vmatpush.msra.mxu3 %v243_v4 }
  0x17   : > { %627 = vmatmul.msk.f32.vlgmr.msra.gmra.mxu2 %vm248_vm1, %v235_v7  ;;  %631 = vmatmul.msk.f32.vlgmr.msra.gmra.mxu3 %vm248_vm1, %v239_v8 }
  0x1d   : > { %620 = vmatmul.msk.f32.gmra.mxu0 %vm248_vm1, %v228_v9  ;;  %624 = vmatmul.msk.f32.gmra.mxu1 %vm248_vm1, %v232_v10 }
  0x1f   : > { %628 = vmatmul.msk.f32.gmra.mxu2 %vm248_vm1, %v236_v11  ;;  %632 = vmatmul.msk.f32.gmra.mxu3 %vm248_vm1, %v240_v12 }
  0x25   : > { %621 = vmatmul.msk.f32.gmra.mxu0 %vm248_vm1, %v229_v13  ;;  %625 = vmatmul.msk.f32.gmra.mxu1 %vm248_vm1, %v233_v14 }
  0x27   : > { %629 = vmatmul.msk.f32.gmra.mxu2 %vm248_vm1, %v237_v15  ;;  %633 = vmatmul.msk.f32.gmra.mxu3 %vm248_vm1, %v241_v16 }
  0x2d   : > { %622 = vmatmul.msk.f32.gmra.mxu0 %vm248_vm1, %v230_v17  ;;  %626 = vmatmul.msk.f32.gmra.mxu1 %vm248_vm1, %v234_v18 }
  0x2f   : > { %630 = vmatmul.msk.f32.gmra.mxu2 %vm248_vm1, %v238_v19  ;;  %634 = vmatmul.msk.f32.gmra.mxu3 %vm248_vm1, %v242_v20 }
  0x92   : > { %v318_v21 = vpop.f32.mrf.mxu0  ;;  %v330_v22 = vpop.f32.mrf.mxu1 }
  0x93   : > { %367 = vst.msk [vmem:[%s818_s12] sm:$0xff] %vm366_vm2, %v318_v21  ;;  %v420_v32 = vmul.f32 %v318_v21, %v318_v21  ;;  %v383_v35 = vsel %vm366_vm2, %v318_v21, 0.0  ;;  %v424_v45 = vmul.f32 %v330_v22, %v330_v22  ;;  %v390_v52 = vsel %vm366_vm2, %v330_v22, 0.0 }
  0x94   : > { %371 = vst.msk [vmem:[%s818_s12 + $0x20] sm:$0xff] %vm366_vm2, %v330_v22 }
  0x95   : > { %v436_v39 = vsel %vm366_vm2, %v420_v32, 0.0  ;;  %v443_v57 = vsel %vm366_vm2, %v424_v45, 0.0 }
  0x9a   : > { %v321_v23 = vpop.f32.mrf.mxu0  ;;  %v333_v24 = vpop.f32.mrf.mxu1 }
  0x9b   : > { %368 = vst.msk [vmem:[%s818_s12 + $0x8] sm:$0xff] %vm366_vm2, %v321_v23  ;;  %v342_v25 = vpop.f32.mrf.mxu2  ;;  %v826_v26 = vpop.f32.mrf.mxu3  ;;  %v421_v29 = vmul.f32 %v321_v23, %v321_v23  ;;  %v384_v33 = vsel %vm366_vm2, %v321_v23, 0.0  ;;  %v425_v53 = vmul.f32 %v333_v24, %v333_v24  ;;  %v392_v58 = vsel %vm366_vm2, %v333_v24, 0.0 }
  0x9c   : > { %372 = vst.msk [vmem:[%s818_s12 + $0x28] sm:$0xff] %vm366_vm2, %v333_v24  ;;  %v385_v38 = vadd.f32 %v384_v33, %v383_v35  ;;  %v428_v4 = vmul.f32 %v342_v25, %v342_v25  ;;  %v398_v11 = vsel %vm366_vm2, %v342_v25, 0.0  ;;  %v406_v33 = vsel %vm366_vm2, %v826_v26, 0.0 }
  0x9d   : > { %375 = vst.msk [vmem:[%s818_s12 + $0x40] sm:$0xff] %vm366_vm2, %v342_v25  ;;  %v437_v36 = vsel %vm366_vm2, %v421_v29, 0.0  ;;  %v445_v63 = vsel %vm366_vm2, %v425_v53, 0.0 }
  0x9e   : > { %379 = vst.msk [vmem:[%s818_s12 + $0x60] sm:$0xff] %vm366_vm2, %v826_v26  ;;  %v438_v41 = vadd.f32 %v437_v36, %v436_v39  ;;  %v451_v15 = vsel %vm366_vm2, %v428_v4, 0.0 }
  0xa2   : > { %v324_v27 = vpop.f32.mrf.mxu0  ;;  %v336_v28 = vpop.f32.mrf.mxu1 }
  0xa3   : > { %369 = vst.msk [vmem:[%s818_s12 + $0x10] sm:$0xff] %vm366_vm2, %v324_v27  ;;  %v345_v30 = vpop.f32.mrf.mxu2  ;;  %v837_v31 = vpop.f32.mrf.mxu3  ;;  %v422_v34 = vmul.f32 %v324_v27, %v324_v27  ;;  %v386_v37 = vsel %vm366_vm2, %v324_v27, 0.0  ;;  %v426_v59 = vmul.f32 %v336_v28, %v336_v28  ;;  %v394_v0 = vsel %vm366_vm2, %v336_v28, 0.0 }
  0xa4   : > { %373 = vst.msk [vmem:[%s818_s12 + $0x30] sm:$0xff] %vm366_vm2, %v336_v28  ;;  %v387_v42 = vadd.f32 %v386_v37, %v385_v38  ;;  %v429_v12 = vmul.f32 %v345_v30, %v345_v30  ;;  %v400_v16 = vsel %vm366_vm2, %v345_v30, 0.0  ;;  %v432_v27 = vmul.f32 %v826_v26, %v826_v26 }
  0xa5   : > { %376 = vst.msk [vmem:[%s818_s12 + $0x48] sm:$0xff] %vm366_vm2, %v345_v30  ;;  %v439_v40 = vsel %vm366_vm2, %v422_v34, 0.0  ;;  %v447_v5 = vsel %vm366_vm2, %v426_v59, 0.0  ;;  %v433_v34 = vmul.f32 %v837_v31, %v837_v31  ;;  %v408_v38 = vsel %vm366_vm2, %v837_v31, 0.0 }
  0xa6   : > { %380 = vst.msk [vmem:[%s818_s12 + $0x68] sm:$0xff] %vm366_vm2, %v837_v31  ;;  %v440_v50 = vadd.f32 %v439_v40, %v438_v41  ;;  %v453_v21 = vsel %vm366_vm2, %v429_v12, 0.0  ;;  %v459_v37 = vsel %vm366_vm2, %v432_v27, 0.0 }
  0xaa   : > { %v327_v43 = vpop.f32.mrf.mxu0  ;;  %v339_v44 = vpop.f32.mrf.mxu1 }
  0xab   : > { %370 = vst.msk [vmem:[%s818_s12 + $0x18] sm:$0xff] %vm366_vm2, %v327_v43  ;;  %v388_v46 = vsel %vm366_vm2, %v327_v43, 0.0  ;;  %v423_v47 = vmul.f32 %v327_v43, %v327_v43  ;;  %v348_v48 = vpop.f32.mrf.mxu2  ;;  %v360_v49 = vpop.f32.mrf.mxu3  ;;  %v427_v60 = vmul.f32 %v339_v44, %v339_v44  ;;  %v396_v1 = vsel %vm366_vm2, %v339_v44, 0.0 }
  0xac   : > { %v389_v51 = vadd.f32 %v388_v46, %v387_v42  ;;  %374 = vst.msk [vmem:[%s818_s12 + $0x38] sm:$0xff] %vm366_vm2, %v339_v44  ;;  %v430_v17 = vmul.f32 %v348_v48, %v348_v48  ;;  %v402_v22 = vsel %vm366_vm2, %v348_v48, 0.0  ;;  %v434_v39 = vmul.f32 %v360_v49, %v360_v49 }
  0xad   : > { %v441_v54 = vsel %vm366_vm2, %v423_v47, 0.0  ;;  %377 = vst.msk [vmem:[%s818_s12 + $0x50] sm:$0xff] %vm366_vm2, %v348_v48  ;;  %v449_v6 = vsel %vm366_vm2, %v427_v60, 0.0  ;;  %v461_v43 = vsel %vm366_vm2, %v433_v34, 0.0  ;;  %v410_v44 = vsel %vm366_vm2, %v360_v49, 0.0 }
  0xae   : > { %v391_v55 = vadd.f32 %v390_v52, %v389_v51  ;;  %v442_v56 = vadd.f32 %v441_v54, %v440_v50  ;;  %381 = vst.msk [vmem:[%s818_s12 + $0x70] sm:$0xff] %vm366_vm2, %v360_v49  ;;  %v455_v28 = vsel %vm366_vm2, %v430_v17, 0.0  ;;  %v463_v47 = vsel %vm366_vm2, %v434_v39, 0.0 }
  0xb0   : > { %v444_v61 = vadd.f32 %v443_v57, %v442_v56  ;;  %v393_v62 = vadd.f32 %v392_v58, %v391_v55 }
  0xb2   : > { %v395_v2 = vadd.f32 %v394_v0, %v393_v62  ;;  %v446_v3 = vadd.f32 %v445_v63, %v444_v61 }
  0xb3   : > { %v351_v7 = vpop.f32.mrf.mxu2  ;;  %v363_v8 = vpop.f32.mrf.mxu3 }
  0xb4   : > { %v448_v9 = vadd.f32 %v447_v5, %v446_v3  ;;  %v397_v10 = vadd.f32 %v396_v1, %v395_v2  ;;  %378 = vst.msk [vmem:[%s818_s12 + $0x58] sm:$0xff] %vm366_vm2, %v351_v7  ;;  %v431_v18 = vmul.f32 %v351_v7, %v351_v7  ;;  %v404_v23 = vsel %vm366_vm2, %v351_v7, 0.0 }
  0xb5   : > { %382 = vst.msk [vmem:[%s818_s12 + $0x78] sm:$0xff] %vm366_vm2, %v363_v8  ;;  %v435_v40 = vmul.f32 %v363_v8, %v363_v8  ;;  %v412_v26 = vsel %vm366_vm2, %v363_v8, 0.0 }
  0xb6   : > { %v399_v13 = vadd.f32 %v398_v11, %v397_v10  ;;  %v450_v14 = vadd.f32 %v449_v6, %v448_v9  ;;  %v457_v29 = vsel %vm366_vm2, %v431_v18, 0.0 }
  0xb7   : > { %v465_v48 = vsel %vm366_vm2, %v435_v40, 0.0 }
  0xb8   : > { %v452_v19 = vadd.f32 %v451_v15, %v450_v14  ;;  %v401_v20 = vadd.f32 %v400_v16, %v399_v13 }
  0xba   : > { %v403_v24 = vadd.f32 %v402_v22, %v401_v20  ;;  %v454_v25 = vadd.f32 %v453_v21, %v452_v19 }
  0xbc   : > { %v456_v30 = vadd.f32 %v455_v28, %v454_v25  ;;  %v405_v32 = vadd.f32 %v404_v23, %v403_v24 }
  0xbe   : > { %v407_v35 = vadd.f32 %v406_v33, %v405_v32  ;;  %v458_v36 = vadd.f32 %v457_v29, %v456_v30 }
  0xc0   : > { %v460_v41 = vadd.f32 %v459_v37, %v458_v36  ;;  %v409_v42 = vadd.f32 %v408_v38, %v407_v35 }
  0xc2   : > { %v411_v45 = vadd.f32 %v410_v44, %v409_v42  ;;  %v462_v46 = vadd.f32 %v461_v43, %v460_v41 }
  0xc4   : > { %v464_v50 = vadd.f32 %v463_v47, %v462_v46  ;;  %v413_v51 = vadd.f32 %v412_v26, %v411_v45 }
  0xc6   : > { %v414_v52 = vrot.slane %v413_v51, 4  ;;  %v466_v31 = vadd.f32 %v465_v48, %v464_v50 }
  0xc8   : > { %v415_v53 = vadd.f32 %v414_v52, %v413_v51  ;;  %v467_v54 = vrot.slane %v466_v31, 4 }
  0xca   : > { %v416_v55 = vrot.slane %v415_v53, 2  ;;  %v468_v56 = vadd.f32 %v467_v54, %v466_v31 }
  0xcc   : > { %v417_v57 = vadd.f32 %v416_v55, %v415_v53  ;;  %v469_v58 = vrot.slane %v468_v56, 2 }
  0xce   : > { %v418_v59 = vrot.slane %v417_v57, 1  ;;  %v470_v49 = vadd.f32 %v469_v58, %v468_v56 }
  0xd0   : > { %v471_v60 = vrot.slane %v470_v49, 1  ;;  %v419_v61 = vadd.f32 %v418_v59, %v417_v57  ;;  %478 = sbr.rel (%p635_p4) target bundleno = 215 (0xd7), region = 40 }
  0xd2   : > { %v472_v62 = vadd.f32 %v471_v60, %v470_v49 }
  0xd4   : > { %v474_v63 = vsel %vm473_vm3, %v419_v61, %v472_v62 }
  0xd5   : > { %vm479_vm4 = vcmask 58368  }
  0xd6   : > { %480 = vst.msk [vmem:[#allocation2] sm:$0x3] %vm479_vm4, %v474_v63 }
  0xd7 PF: > { %p636_p5 = scmp.le.s32.totalorder %s751_s19, 0 }
  0xd9   : > { %484 = sbr.rel (%p636_p5) target bundleno = 226 (0xe2), region = 44 }
  0xde   : > { %v485_v0 = vld [vmem:[#allocation2] sm:$0x3]  ;;  %vm487_vm5 = vcmask 58368  }
  0xdf   : > { %v486_v1 = vadd.f32 %v485_v0, %v474_v63 }
  0xe1   : > { %488 = vst.msk [vmem:[#allocation2] sm:$0x3] %vm487_vm5, %v486_v1 }
  0xe2 PF: > { %p637_p6 = scmp.ne.s32.totalorder %s751_s19, 3 }
  0xe4   : > { %492 = sbr.rel (%p637_p6) target bundleno = 280 (0x118), region = 48 }
  0xe9   : > { %v493_v2 = vld [vmem:[#allocation2] sm:$0x3]  ;;  %v500_v15 = vld [vmem:[%s916_s2] sm:$0x1]  ;;  %vm525_vm9 = vcmask 58368  }
  0xea   : > { %v494_v3 = vmul.f32 0.001953125, %v493_v2  ;;  %v518_v18 = vld [vmem:[%s917_s3] sm:$0x1] }
  0xec   : > { %v495_v4 = vmul.f32 %v494_v3, %v494_v3 }
  0xee   : > { %v497_v5 = vrot.slane %v495_v4, 7 }
  0xf0   : > { %v499_v6 = vsub.f32 %v494_v3, %v497_v5 }
  0xf2   : > { %v501_v7 = vadd.f32 1e-05, %v499_v6 }
  0xf4   : > { %672 = vrsqrt.f32 %v501_v7  ;;  %vm508_vm6 = vweird.f32 %v501_v7 }
  0xfa   : > { %v673_v8 = vpop.eup %672 }
  0xfb   : > { %v503_v9 = vmul.f32 %v673_v8, %v501_v7  ;;  %vm509_vm7 = vweird.f32 %v673_v8 }
  0xfc   : > { %vm510_vm8 = vmor %vm508_vm6, %vm509_vm7 }
  0xfd   : > { %v504_v10 = vmul.f32 %v673_v8, %v503_v9 }
  0xff   : > { %v505_v11 = vmul.f32 0.5, %v504_v10 }
 0x101   : > { %v506_v12 = vsub.f32 1.5, %v505_v11 }
 0x103   : > { %v507_v13 = vmul.f32 %v673_v8, %v506_v12 }
 0x105   : > { %v511_v14 = vsel %vm510_vm8, %v673_v8, %v507_v13 }
 0x106   : > { %513 = vst [vmem:[#allocation1] sm:$0xff] %v511_v14 }
 0x10d   : > { %v515_v16 = vld [vmem:[#allocation1 + $0x1] ss:$9 sm:$0xff] }
 0x10e   : > { %v517_v17 = vmul.f32 %v515_v16, %v500_v15 }
 0x110   : > { %v519_v19 = vmul.f32 %v517_v17, %v494_v3 }
 0x112   : > { %v520_v20 = vsub.f32 %v518_v18, %v519_v19 }
 0x114   : > { %v522_v21 = vperm.slane %v520_v20, 0 }
 0x116   : > { %v524_v22 = vsel %vm473_vm3, %v517_v17, %v522_v21 }
 0x117   : > { %526 = vst.msk [vmem:[#allocation2] sm:$0x3] %vm525_vm9, %v524_v22 }
 0x118 PF: > { %p661_p7 = scmp.eq.s32.totalorder %s751_s19, 3  ;;  %s714_s17 = smov [#allocation2]  }
 0x119   : > { %s542_s20 = sshll.u32 %s714_s17, 4  ;;  %s544_s23 = sshll.u32 %s919_s5, 4  ;;  %s543_s20 = int_to_ptr.vmem [resolvable:$true] %s542_s20  ;;  %s545_s23 = int_to_ptr.hbm [resolvable:$true] %s544_s23 }
 0x11a   : > { %658 = dma.vmem_to_hbm [thread:$0]  (%p661_p7), %s543_s20, 32, %s545_s23, [#allocation3]  }
 0x11b   : > { %707 = dma.done.wait (%p661_p7), [#allocation3], 32  }
 0x11c   : > { %709 = vsyncadd (%p661_p7), [#allocation3], 4294967264 }
 0x11d PF: > { %s17_s18 = sadd.s32 1, %s712_s18  }
 0x11e   : > { %p14_p8 = scmp.ge.s32.totalorder %s17_s18, 6  }
 0x120   :  { %16 = sbr.rel (!%p14_p8) target bundleno = 1 (0x1), region = 88 }
 0x125   :  { %566 = vsyncpa [#allocation3], 1 }
 0x126   :  { %568 = vsyncpa [#allocation3 + $0x1], 1 }

</bundles_post_ra>
